<compile_context>
chip_gen: v7x
topology: tpu7x:2x2x1
jax: 0.10.0
libtpu: 0.0.40
codegen_flags: <defaults>
</compile_context>

<pallas_src>
import jax
import jax.numpy as jnp
from jax.experimental import pallas as pl
from jax.experimental.pallas import tpu as pltpu


def _convt_phase_kernel(xc_ref, w_ref, y_ref, st_ref, stat_acc):
    """One row tile of the phase-decomposed stride-2 ConvTranspose2d.

    xc_ref   : (1, TM, 4*Cin)   pre-stacked shifted-input tile
    w_ref    : (4*Cin, 4*Cout)  phase-packed weights
    y_ref    : (1, TM, 4*Cout)  phase-blocked conv output tile (bf16 by default)
    st_ref   : (1, 2, 4*Cout)   per-batch-item [col sums ; col sums of squares]
    stat_acc : (2, 4*Cout) f32  VMEM scratch accumulated across the row-tile axis
    """
    t = pl.program_id(1)

    @pl.when(t == 0)
    def _():
        stat_acc[...] = jnp.zeros_like(stat_acc)

    y = jnp.dot(xc_ref[0], w_ref[...], preferred_element_type=jnp.float32)
    y_ref[0] = y.astype(y_ref.dtype)

    # Partial BN statistics from the f32 accumulator (folded per-channel in the wrapper).
    s = jnp.sum(y, axis=0, keepdims=True)                     # (1, 4*Cout)
    ss = jnp.sum(y * y, axis=0, keepdims=True)                # (1, 4*Cout)
    stat_acc[...] += jnp.concatenate([s, ss], axis=0)         # (2, 4*Cout)

    @pl.when(t == pl.num_programs(1) - 1)
    def _():
        st_ref[0] = stat_acc[...]


def _pick_row_tile(hw, target=512):
    """Largest multiple-of-8 divisor of hw that is <= target (else the full extent)."""
    best = hw
    d = 8
    while d <= min(hw, target):
        if hw % d == 0:
            best = d
        d += 8
    return best


def upconv_bn_relu(x_nchw, weight, bias, gamma, beta, *,
                   stride=2, padding=1, output_padding=1, eps=1e-5,
                   matmul_dtype=jnp.bfloat16, intermediate_dtype=jnp.bfloat16,
                   row_tile=None):
    """ConvTranspose2d(K=3, stride=2, pad=1, out_pad=1) -> BatchNorm2d(train) -> ReLU.

    NCHW in / NCHW out (PyTorch convention). `bias` is accepted for interface parity but
    unused: under training-mode BatchNorm the conv bias is exactly cancelled by the mean
    subtraction.
    """
    del bias
    N, Cin, H, W = x_nchw.shape
    Cin_w, Cout, K, Kw = weight.shape
    assert Cin == Cin_w and K == Kw == 3
    assert stride == 2 and padding == 1 and output_padding == 1, \
        "phase decomposition is implemented for the standard 2x-upsampling config"
    Ho, Wo = 2 * H, 2 * W
    HW = H * W
    C4i, C4o = 4 * Cin, 4 * Cout

    if row_tile is None:
        row_tile = _pick_row_tile(HW)
    assert HW % row_tile == 0 and (row_tile % 8 == 0 or row_tile == HW), row_tile
    n_tiles = HW // row_tile

    # --- Pre-stack the 4 shifted input views (lane-dense; input touched once in HBM:
    #     XLA fuses the transpose + halo pad + slices + concat into a single pass). ---
    x = jnp.transpose(x_nchw, (0, 2, 3, 1))                   # NHWC
    xp = jnp.pad(x, ((0, 0), (0, 1), (0, 1), (0, 0)))         # bottom/right halo pixel
    xcat = jnp.concatenate(
        [xp[:, di:di + H, dj:dj + W, :]
         for (di, dj) in ((0, 0), (0, 1), (1, 0), (1, 1))],
        axis=-1).reshape(N, HW, C4i).astype(matmul_dtype)     # (N, H*W, 4*Cin)

    # --- Phase-packed weights: row groups = shifted-input group (x00, x01, x10, x11),
    #     column groups = output phase (r, c) in order (0,0), (0,1), (1,0), (1,1). ---
    wf = weight.astype(jnp.float32)
    Wm = lambda kh, kw: wf[:, :, kh, kw]                      # (Cin, Cout)
    Z = jnp.zeros((Cin, Cout), jnp.float32)
    w_big = jnp.concatenate([
        jnp.concatenate([Wm(1, 1), Wm(1, 2), Wm(2, 1), Wm(2, 2)], axis=1),  # x[i,   j  ]
        jnp.concatenate([Z,        Wm(1, 0), Z,        Wm(2, 0)], axis=1),  # x[i,   j+1]
        jnp.concatenate([Z,        Z,        Wm(0, 1), Wm(0, 2)], axis=1),  # x[i+1, j  ]
        jnp.concatenate([Z,        Z,        Z,        Wm(0, 0)], axis=1),  # x[i+1, j+1]
    ], axis=0).astype(matmul_dtype)                           # (4*Cin, 4*Cout)

    y_phase, stats = pl.pallas_call(
        _convt_phase_kernel,
        out_shape=(jax.ShapeDtypeStruct((N, HW, C4o), intermediate_dtype),
                   jax.ShapeDtypeStruct((N, 2, C4o), jnp.float32)),
        grid=(N, n_tiles),
        in_specs=[
            pl.BlockSpec((1, row_tile, C4i), lambda n, t: (n, t, 0)),
            pl.BlockSpec((C4i, C4o), lambda n, t: (0, 0)),
        ],
        out_specs=(
            pl.BlockSpec((1, row_tile, C4o), lambda n, t: (n, t, 0)),
            pl.BlockSpec((1, 2, C4o), lambda n, t: (n, 0, 0)),
        ),
        scratch_shapes=[pltpu.VMEM((2, C4o), jnp.float32)],
        compiler_params=pltpu.CompilerParams(
            # Stats accumulate across the row-tile axis -> it must stay sequential.
            dimension_semantics=("parallel", "arbitrary"),
            # Above the 16/32 MiB scoped defaults, below v7x's 64 MiB physical VMEM.
            vmem_limit_bytes=48 * 1024 * 1024,
        ),
    )(xcat, w_big)

    # --- Fold statistics into per-channel BN scale/shift (tiny XLA work). ---
    count = jnp.float32(N * Ho * Wo)
    col = jnp.sum(stats, axis=0)                              # (2, 4*Cout)
    ch_sum = jnp.sum(col[0].reshape(4, Cout), axis=0)         # (Cout,)
    ch_ssq = jnp.sum(col[1].reshape(4, Cout), axis=0)         # (Cout,)
    mean = ch_sum / count
    var = jnp.maximum(ch_ssq / count - mean * mean, 0.0)      # biased var, clamped >= 0
    inv = jax.lax.rsqrt(var + eps)
    scale = gamma.astype(jnp.float32) * inv
    shift = beta.astype(jnp.float32) - mean * scale
    scale4 = jnp.tile(scale, 4)                               # columns are (phase, channel)
    shift4 = jnp.tile(shift, 4)

    # --- BN apply + ReLU fused by XLA into the single de-interleave/NCHW transpose,
    #     so the full-resolution output is written to HBM exactly once. ---
    out_phase = jnp.maximum(y_phase.astype(jnp.float32) * scale4 + shift4, 0.0)
    out = out_phase.reshape(N, H, W, 2, 2, Cout)
    out = jnp.transpose(out, (0, 5, 1, 3, 2, 4)).reshape(N, Cout, Ho, Wo)
    return out


def _reference(x_nchw, weight, bias, gamma, beta, *,
               stride, padding, output_padding, eps=1e-5):
    """Plain-JAX reference (lax conv) for numerical validation (includes the conv bias)."""
    x = jnp.transpose(x_nchw, (0, 2, 3, 1))
    K = weight.shape[2]
    w_conv = jnp.transpose(weight[:, :, ::-1, ::-1], (2, 3, 0, 1))
    lo = K - 1 - padding
    hi = K - 1 - padding + output_padding
    y = jax.lax.conv_general_dilated(
        x, w_conv, window_strides=(1, 1),
        padding=((lo, hi), (lo, hi)), lhs_dilation=(stride, stride),
        dimension_numbers=("NHWC", "HWIO", "NHWC")) + bias[None, None, None, :]
    mean = jnp.mean(y, axis=(0, 1, 2), keepdims=True)
    var = jnp.mean(jnp.square(y - mean), axis=(0, 1, 2), keepdims=True)
    out = (y - mean) * jax.lax.rsqrt(var + eps) * gamma + beta
    out = jnp.maximum(out, 0.0)
    return jnp.transpose(out, (0, 3, 1, 2))


if __name__ == "__main__":
    key = jax.random.PRNGKey(0)
    k1, k2, k3, k4, k5 = jax.random.split(key, 5)

    # Small shapes; Cout multiple of 32 -> 4*Cout = 128 (lane-dense output, like the
    # real TRecgNet upsample layers where Cout in {64, 128, 256}).
    N, Cin, H, W = 2, 32, 8, 8
    Cout, K = 32, 3
    stride, padding, output_padding = 2, 1, 1

    x = jax.random.normal(k1, (N, Cin, H, W), jnp.float32)
    weight = 0.1 * jax.random.normal(k2, (Cin, Cout, K, K), jnp.float32)   # ConvT (Cin,Cout,K,K)
    bias = 0.1 * jax.random.normal(k3, (Cout,), jnp.float32)
    gamma = 1.0 + 0.1 * jax.random.normal(k4, (Cout,), jnp.float32)        # BN weight
    beta = 0.1 * jax.random.normal(k5, (Cout,), jnp.float32)               # BN bias

    ref = _reference(x, weight, bias, gamma, beta, stride=stride,
                     padding=padding, output_padding=output_padding)

    # Exact-math path (f32 MXU + f32 intermediate); row_tile=16 exercises the
    # multi-tile stats accumulator (grid = (2, 4)).
    out_f32 = upconv_bn_relu(x, weight, bias, gamma, beta,
                             matmul_dtype=jnp.float32,
                             intermediate_dtype=jnp.float32,
                             row_tile=16)
    out_f32 = jax.block_until_ready(out_f32)
    assert out_f32.shape == (N, Cout, 2 * H, 2 * W), out_f32.shape
    assert jnp.allclose(out_f32, ref, atol=1e-4, rtol=1e-4), "f32 path mismatch vs reference"

    # Production path: bf16 MXU inputs + bf16 intermediate (f32 accumulation), auto tile.
    out_bf16 = upconv_bn_relu(x, weight, bias, gamma, beta)
    out_bf16 = jax.block_until_ready(out_bf16)
    assert out_bf16.shape == (N, Cout, 2 * H, 2 * W), out_bf16.shape
    assert jnp.allclose(out_bf16, ref, atol=5e-2, rtol=5e-2), "bf16 path mismatch vs reference"

    print("KERNEL_OK")
</pallas_src>

<mosaic_0001>
module attributes {stable_mosaic.version = 11 : i64} {
  func.func @_convt_phase_kernel(%arg0: i32, %arg1: i32, %arg2: memref<1x16x128xf32, #tpu.memory_space<vmem>>, %arg3: memref<128x128xf32, #tpu.memory_space<vmem>>, %arg4: memref<1x16x128xf32, #tpu.memory_space<vmem>>, %arg5: memref<1x2x128xf32, #tpu.memory_space<vmem>>, %arg6: memref<2x128xf32, #tpu.memory_space<vmem>>) attributes {dimension_semantics = [#tpu.dimension_semantics<parallel>, #tpu.dimension_semantics<arbitrary>], iteration_bounds = array<i64: 2, 4>, scalar_prefetch = 0 : i64, scratch_operands = 1 : i64, tpu.core_type = #tpu.core_type<tc>, window_params = [{transform_indices = @transform_0, window_bounds = array<i64: 1, 16, 128>}, {pipeline_mode = #tpu.pipeline_mode<synchronous>, transform_indices = @transform_1, window_bounds = array<i64: 128, 128>}, {transform_indices = @transform_2, window_bounds = array<i64: 1, 16, 128>}, {transform_indices = @transform_3, window_bounds = array<i64: 1, 2, 128>}]} {
    %c0_i32 = arith.constant 0 : i32
    %0 = arith.cmpi eq, %arg1, %c0_i32 : i32
    %1 = arith.extui %0 : i1 to i32
    %c0_i32_0 = arith.constant 0 : i32
    %2 = arith.cmpi ne, %1, %c0_i32_0 : i32
    scf.if %2 {
      %cst_15 = arith.constant 0.000000e+00 : f32
      %22 = vector.broadcast %cst_15 : f32 to vector<2x128xf32>
      %c0_16 = arith.constant 0 : index
      %c0_17 = arith.constant 0 : index
      %23 = vector.load %arg6[%c0_16, %c0_17] : memref<2x128xf32, #tpu.memory_space<vmem>>, vector<2x128xf32>
      tpu.vector_store %arg6[%c0_16, %c0_17], %22 {strides = array<i32>} : memref<2x128xf32, #tpu.memory_space<vmem>>, vector<2x128xf32>,
    } else {
    }
    %c0 = arith.constant 0 : index
    %c0_1 = arith.constant 0 : index
    %c0_2 = arith.constant 0 : index
    %3 = vector.load %arg2[%c0, %c0_1, %c0_2] : memref<1x16x128xf32, #tpu.memory_space<vmem>>, vector<1x16x128xf32>
    %4 = vector.shape_cast %3 : vector<1x16x128xf32> to vector<16x128xf32>
    %c0_3 = arith.constant 0 : index
    %c0_4 = arith.constant 0 : index
    %5 = vector.load %arg3[%c0_3, %c0_4] : memref<128x128xf32, #tpu.memory_space<vmem>>, vector<128x128xf32>
    %cst = arith.constant dense<0.000000e+00> : vector<16x128xf32>
    %6 = tpu.matmul %4, %5, %cst {dimension_numbers = #tpu.dot_dimension_numbers<[1], [0], [0], [1], [0, 0, 1, 1], [], []>} : vector<16x128xf32>, vector<128x128xf32>, vector<16x128xf32> -> vector<16x128xf32>
    %c0_5 = arith.constant 0 : index
    %c0_6 = arith.constant 0 : index
    %c0_7 = arith.constant 0 : index
    %7 = vector.load %arg4[%c0_5, %c0_6, %c0_7] : memref<1x16x128xf32, #tpu.memory_space<vmem>>, vector<1x16x128xf32>
    %8 = vector.shape_cast %7 : vector<1x16x128xf32> to vector<16x128xf32>
    %9 = vector.shape_cast %6 : vector<16x128xf32> to vector<1x16x128xf32>
    tpu.vector_store %arg4[%c0_5, %c0_6, %c0_7], %9 {strides = array<i32>} : memref<1x16x128xf32, #tpu.memory_space<vmem>>, vector<1x16x128xf32>,
    %cst_8 = arith.constant dense<0.000000e+00> : vector<128xf32>
    %10 = vector.multi_reduction <add>, %6, %cst_8 [0] : vector<16x128xf32> to vector<128xf32>
    %11 = vector.shape_cast %10 : vector<128xf32> to vector<1x128xf32>
    %12 = arith.mulf %6, %6 : vector<16x128xf32>
    %cst_9 = arith.constant dense<0.000000e+00> : vector<128xf32>
    %13 = vector.multi_reduction <add>, %12, %cst_9 [0] : vector<16x128xf32> to vector<128xf32>
    %14 = vector.shape_cast %13 : vector<128xf32> to vector<1x128xf32>
    %c0_10 = arith.constant 0 : index
    %c0_11 = arith.constant 0 : index
    %15 = vector.load %arg6[%c0_10, %c0_11] : memref<2x128xf32, #tpu.memory_space<vmem>>, vector<2x128xf32>
    %16 = tpu.concatenate %11, %14 in 0 : vector<1x128xf32>, vector<1x128xf32> -> vector<2x128xf32>
    %17 = arith.addf %15, %16 : vector<2x128xf32>
    %c0_12 = arith.constant 0 : index
    %c0_13 = arith.constant 0 : index
    %18 = vector.load %arg6[%c0_12, %c0_13] : memref<2x128xf32, #tpu.memory_space<vmem>>, vector<2x128xf32>
    tpu.vector_store %arg6[%c0_12, %c0_13], %17 {strides = array<i32>} : memref<2x128xf32, #tpu.memory_space<vmem>>, vector<2x128xf32>,
    %c3_i32 = arith.constant 3 : i32
    %19 = arith.cmpi eq, %arg1, %c3_i32 : i32
    %20 = arith.extui %19 : i1 to i32
    %c0_i32_14 = arith.constant 0 : i32
    %21 = arith.cmpi ne, %20, %c0_i32_14 : i32
    scf.if %21 {
      %c0_15 = arith.constant 0 : index
      %c0_16 = arith.constant 0 : index
      %22 = vector.load %arg6[%c0_15, %c0_16] : memref<2x128xf32, #tpu.memory_space<vmem>>, vector<2x128xf32>
      %c0_17 = arith.constant 0 : index
      %c0_18 = arith.constant 0 : index
      %c0_19 = arith.constant 0 : index
      %23 = vector.load %arg5[%c0_17, %c0_18, %c0_19] : memref<1x2x128xf32, #tpu.memory_space<vmem>>, vector<1x2x128xf32>
      %24 = vector.shape_cast %23 : vector<1x2x128xf32> to vector<2x128xf32>
      %25 = vector.shape_cast %22 : vector<2x128xf32> to vector<1x2x128xf32>
      tpu.vector_store %arg5[%c0_17, %c0_18, %c0_19], %25 {strides = array<i32>} : memref<1x2x128xf32, #tpu.memory_space<vmem>>, vector<1x2x128xf32>,
    } else {
    }
    return
  }
  func.func @transform_0(%arg0: i32, %arg1: i32) -> (i32, i32, i32) {
    %c0_i32 = arith.constant 0 : i32
    %c0_i32_0 = arith.constant 0 : i32
    return %arg0, %arg1, %c0_i32 : i32, i32, i32
  }
  func.func @transform_1(%arg0: i32, %arg1: i32) -> (i32, i32) {
    %c0_i32 = arith.constant 0 : i32
    %c0_i32_0 = arith.constant 0 : i32
    %c0_i32_1 = arith.constant 0 : i32
    return %c0_i32, %c0_i32_0 : i32, i32
  }
  func.func @transform_2(%arg0: i32, %arg1: i32) -> (i32, i32, i32) {
    %c0_i32 = arith.constant 0 : i32
    %c0_i32_0 = arith.constant 0 : i32
    return %arg0, %arg1, %c0_i32 : i32, i32, i32
  }
  func.func @transform_3(%arg0: i32, %arg1: i32) -> (i32, i32, i32) {
    %c0_i32 = arith.constant 0 : i32
    %c0_i32_0 = arith.constant 0 : i32
    %c0_i32_1 = arith.constant 0 : i32
    return %arg0, %c0_i32, %c0_i32_0 : i32, i32, i32
  }
}

</mosaic_0001>

<bundles_post_ra>
// kernel: tpu_custom_call.1
= control target key start
LH: loop header
LB: loop body
LE: loop exit
PB: predicated region body
PF: predicated region fallthrough
CT: control target
= control target key end

     0   :  { %s1349_s0 = inlined_call_operand.hbm [shape: f32[2,64,128], index: 0, kind: input, shape index: {}]   ;;  %s1350_s1 = inlined_call_operand.hbm [shape: f32[128,128], index: 1, kind: input, shape index: {}]   ;;  %s1351_s2 = inlined_call_operand.hbm [shape: f32[2,64,128], index: 2, kind: output, shape index: {0}]   ;;  %s1352_s3 = inlined_call_operand.hbm [shape: f32[2,2,128], index: 3, kind: output, shape index: {1}]  }
   0x1   :  { %1371 = sst [smem:[#allocation22_spill]] %s1349_s0 }
   0x2   :  { %1372 = sst [smem:[#allocation23_spill]] %s1350_s1 }
   0x3   :  { %1373 = sst [smem:[#allocation24_spill]] %s1351_s2 }
   0x4   :  { %1374 = sst [smem:[#allocation25_spill]] %s1352_s3 }
   0x5   :  { %9 = vsyncpa [#allocation4], 0 }
   0x6   :  { %11 = vsyncpa [#allocation4 + $0x1], 0 }
   0x7   :  { %12 = vsyncpa [#allocation7], 0 }
   0x8   :  { %13 = vsyncpa [#allocation5], 0 }
   0x9   :  { %15 = vsyncpa [#allocation5 + $0x1], 0 }
   0xa   :  { %16 = vsyncpa [#allocation10], 0 }
   0xb   :  { %18 = vsyncpa [#allocation10 + $0x1], 0  ;;  %s1007_s12 = smov 0   ;;  %s1009_s13 = smov 0  }
   0xc   :  { %s1011_s14 = smov 0   ;;  %s1013_s15 = smov 0  }
   0xd   :  { %s1015_s16 = smov 0   ;;  %s1017_s17 = smov 0  }
   0xe   :  { %s1019_s18 = smov 0   ;;  %s1021_s19 = smov 0  }
   0xf   :  { %s1023_s20 = smov 0   ;;  %s1025_s21 = smov 0  }
  0x10   :  { %s1027_s22 = smov 0  }
  0x11 LB: > { %1375 = sst [smem:[#allocation15_spill]] %s936_s12  ;;  %s528_s23 = sadd.s32 4294967295, %s976_s22   ;;  %s976_s22 = sphi %s1027_s22, %s24_s22   ;;  %s972_s21 = sphi %s1025_s21, %s1424_s21   ;;  %s968_s20 = sphi %s1023_s20, %s1423_s20   ;;  %s964_s19 = sphi %s1021_s19, %s1422_s19   ;;  %s960_s18 = sphi %s1019_s18, %s1421_s18   ;;  %s956_s17 = sphi %s1017_s17, %s1420_s17   ;;  %s952_s16 = sphi %s1015_s16, %s1419_s16   ;;  %s948_s15 = sphi %s1013_s15, %s1418_s15   ;;  %s944_s14 = sphi %s1011_s14, %s1417_s14   ;;  %s940_s13 = sphi %s1009_s13, %s1416_s13   ;;  %s936_s12 = sphi %s1007_s12, %s1415_s12  }
  0x12   : > { %1376 = sst [smem:[#allocation16_spill]] %s948_s15  ;;  %s529_s24 = sadd.s32 4294967294, %s976_s22  }
  0x13   : > { %p58_p0 = scmp.ne.s32.totalorder %s952_s16, %s948_s15  ;;  %p1066_p1 = scmp.eq.s32.totalorder %s528_s23, 0 }
  0x14   : > { %p1070_p2 = scmp.eq.s32.totalorder %s528_s23, 7  ;;  %p111_p3 = scmp.eq.s32.totalorder %s529_s24, 7 }
  0x15   : > { %s1377_s25 = scalar_select %p1066_p1, 1, 0 }
  0x16   : > { %s1378_s26 = scalar_select %p1070_p2, 1, 0 }
  0x17   : > { %p1076_p4 = por %p1066_p1, %p58_p0  ;;  %p1081_p5 = por %p111_p3, %p58_p0 }
  0x18   : > { %p130_p6 = scmp.ne.s32.totalorder %s944_s14, %s940_s13  ;;  %p136_p7 = scmp.ne.s32.totalorder %s940_s13, %s936_s12 }
  0x19   : > { %s1379_s27 = scalar_select %p1076_p4, 1, 0 }
  0x1a   : > { %s1380_s29 = scalar_select %p1081_p5, 1, 0 }
  0x1b   : > { %p530_p8 = scmp.ge.s32.totalorder %s976_s22, 1  ;;  %p1092_p9 = por %p130_p6, %p1070_p2 }
  0x1c   : > { %1381 = sst [smem:[#allocation17_spill]] %s1380_s29  ;;  %p144_p10 = scmp.lt.s32.totalorder %s976_s22, 9 }
  0x1d   : > { %s1382_s30 = scalar_select %p1092_p9, 1, 0 }
  0x1e   : > { %p1097_p11 = por %p136_p7, %p111_p3  ;;  %p1101_p12 = pnand %p530_p8, %p144_p10 }
  0x1f   : > { %1383 = sst [smem:[#allocation18_spill]] %s1382_s30  ;;  %s978_s6 = smov [#allocation6]  }
  0x20   : > { %s1384_s4 = scalar_select %p1097_p11, 1, 0 }
  0x21   : > { %s1386_s5 = scalar_select %p1101_p12, 1, 0 }
  0x22   : > { %1385 = sst [smem:[#allocation19_spill]] %s1384_s4  ;;  %s156_s7 = sshll.u32 %s978_s6, 4  ;;  %s157_s7 = int_to_ptr.vmem [resolvable:$true] %s156_s7 }
  0x23   : > { %p647_p13 = pneg %p1101_p12  ;;  %s1388_s1 = sld [smem:[#allocation23_spill]] }
  0x25   : > { %p1109_p0 = pnand %p647_p13, %p1066_p1 }
  0x27   : > { %p762_p6 = pneg %p1109_p0 }
  0x29   : > { %s760_s11 = scalar_lea.hbm %s1388_s1, 2048 }
  0x2a   : > { %p761_p3 = scmp.ne.s32.totalorder %s1388_s1, %s760_s11  ;;  %p767_p10 = scmp.lt.u32.totalorder %s760_s11, %s1388_s1 }
  0x2c   : > { %p763_p7 = pnand %p762_p6, %p761_p3 }
  0x2e   : > { %p764_p8 = pneg %p763_p7 }
  0x30   : > { %p769_p13 = pnand %p767_p10, %p764_p8 }
  0x32   : > { %772 = shalt.err (!%p769_p13)
}
  0x33   : > { %s773_s4 = scalar_lea.vmem %s157_s7, 2048  ;;  %p781_p1 = scmp.lt.s32.totalorder %s157_s7, %s157_s7 }
  0x34   : > { %p774_p11 = scmp.ne.s32.totalorder %s157_s7, %s773_s4  ;;  %p782_p4 = scmp.lt.s32.totalorder %s773_s4, %s773_s4 }
  0x36   : > { %p776_p5 = pnand %p774_p11, %p762_p6  ;;  %p783_p12 = por %p782_p4, %p781_p1 }
  0x38   : > { %p777_p9 = pneg %p776_p5 }
  0x3a   : > { %p784_p2 = pnand %p783_p12, %p777_p9 }
  0x3c   : > { %787 = shalt.err (!%p784_p2)
}
  0x3d   : > { %s1360_s9 = smov 128   ;;  %s1361_s28 = smov 8  }
  0x3e   : > { %650 = dma.hbm_to_vmem [thread:$0]  (!%p1109_p0), %s1388_s1, 2048, %s157_s7, [#allocation7], %s1360_s9, %s1360_s9, %s1361_s28  }
  0x3f   : > { %s33_s11 = sadd.s32 1, %s968_s20  ;;  %s36_s23 = sadd.s32 1, %s972_s21 }
  0x40   : > { %p34_p1 = scmp.ge.s32.totalorder %s33_s11, 4  ;;  %s45_s24 = sadd.s32 1, %s956_s17 }
  0x41   : > { %p52_p2 = scmp.ne.s32.totalorder %s956_s17, %s952_s16  ;;  %p53_p4 = scmp.eq.s32.totalorder %s976_s22, 0 }
  0x42   : > { %s1426_s11 = smov (%p34_p1, %s33_s11), 0  ;;  %s1428_s23 = smov (!%p34_p1, %s36_s23), %s972_s21 }
  0x43   : > { %1389 = sst [smem:[#allocation20_spill]] %s1426_s11  ;;  %s41_s8 = ssub.s32 %s968_s20, %s1426_s11 }
  0x44   : > { %p1143_p5 = por %p53_p4, %p52_p2  ;;  %p38_p9 = scmp.ge.s32.totalorder %s1428_s23, 2 }
  0x45   : > { %p1391_p11 = scmp.ne.s32.totalorder %s1378_s26, 0  ;;  %p663_p0 = scmp.lt.s32.totalorder %s976_s22, 8 }
  0x46   : > { %s170_s4 = sand.u32 1, %s956_s17   ;;  %s1430_s23 = smov (%p38_p9, %s1428_s23), 0 }
  0x47   : > { %p1149_p12 = por %p1391_p11, %p52_p2  ;;  %1393 = sst [smem:[#allocation21_spill]] %s1430_s23 }
  0x48   : > { %s533_s10 = sshll.u32 %s170_s4, 4  ;;  %s40_s9 = ssub.s32 %s972_s21, %s1430_s23 }
  0x49   : > { %s42_s28 = sor.u32 %s41_s8, %s40_s9  ;;  %p118_p3 = scmp.eq.s32.totalorder %s40_s9, 0 }
  0x4a   : > { %p43_p6 = scmp.eq.s32.totalorder %s42_s28, 0  ;;  %s534_s1 = sshll.u32 %s968_s20, 1 }
  0x4b   : > { %s1394_s11 = sadd.s32 1, %s944_s14  ;;  %s535_s29 = sshll.u32 %s972_s21, 3 }
  0x4c   : > { %s1163_s12 = scalar_select %p118_p3, %s944_s14, %s1394_s11  }
  0x4d   : > { %s1166_s26 = scalar_select %p43_p6, %s956_s17, %s45_s24  }
  0x4e   : > { %s174_s15 = scalar_lea.vmem [#allocation3], %s533_s10  ;;  %s180_s30 = sadd.s32 %s535_s29, %s534_s1 }
  0x4f   : > { %s183_s3 = sshll.u32 %s174_s15, 4  ;;  %s536_s2 = sshll.u32 %s180_s30, 7  ;;  %s1169_s3 = int_to_ptr.vmem [resolvable:$true] %s183_s3 }
  0x50   : > { %p1175_p7 = pnand %p663_p0, %p1143_p5  ;;  %s1396_s0 = sld [smem:[#allocation22_spill]] }
  0x51   : > { %s1184_s1 = scalar_lea.sflag [#allocation4], %s170_s4 }
  0x52   : > { %p790_p10 = pneg %p1175_p7 }
  0x56   : > { %s1182_s11 = scalar_lea.hbm %s1396_s0, %s536_s2  ;;  %s793_s24 = scalar_lea.hbm %s1396_s0, 2048 }
  0x57   : > { %s788_s15 = scalar_lea.hbm %s1182_s11, 256  ;;  %p794_p2 = scmp.lt.u32.totalorder %s1182_s11, %s1396_s0 }
  0x58   : > { %p789_p8 = scmp.ne.s32.totalorder %s1182_s11, %s788_s15  ;;  %p795_p4 = scmp.lt.u32.totalorder %s793_s24, %s788_s15 }
  0x59   : > { %p797_p9 = scmp.lt.u32.totalorder %s788_s15, %s1182_s11 }
  0x5a   : > { %p791_p13 = pnand %p790_p10, %p789_p8  ;;  %p796_p5 = por %p795_p4, %p794_p2 }
  0x5c   : > { %p792_p1 = pneg %p791_p13  ;;  %p798_p11 = por %p797_p9, %p796_p5 }
  0x5e   : > { %p799_p0 = pnand %p798_p11, %p792_p1 }
  0x60   : > { %802 = shalt.err (!%p799_p0)
}
  0x61   : > { %s803_s6 = scalar_lea.vmem %s1169_s3, 256  ;;  %s981_s4 = smov [#allocation3]  }
  0x62   : > { %p804_p3 = scmp.ne.s32.totalorder %s1169_s3, %s803_s6  ;;  %s808_s10 = sshll.u32 %s981_s4, 4  ;;  %s809_s10 = int_to_ptr.vmem [resolvable:$false] %s808_s10 }
  0x63   : > { %s810_s9 = scalar_lea.vmem %s809_s10, 512  ;;  %p811_p13 = scmp.lt.s32.totalorder %s1169_s3, %s809_s10 }
  0x64   : > { %p806_p6 = pnand %p804_p3, %p790_p10  ;;  %p812_p2 = scmp.lt.s32.totalorder %s810_s9, %s803_s6 }
  0x66   : > { %p807_p8 = pneg %p806_p6  ;;  %p813_p4 = por %p812_p2, %p811_p13 }
  0x68   : > { %p814_p5 = pnand %p813_p4, %p807_p8 }
  0x6a   : > { %817 = shalt.err (!%p814_p5)
}
  0x6b   : > { %s1397_s28 = smov 8   ;;  %s1398_s15 = smov 128  }
  0x6c   : > { %654 = dma.hbm_to_vmem [thread:$0]  (!%p1175_p7), %s1182_s11, 256, %s1169_s3, %s1184_s1, %s1398_s15, %s1398_s15, %s1397_s28  }
  0x6d   : > { %p1399_p10 = scmp.ne.s32.totalorder %s1386_s5, 0 }
  0x6e   : > { %s1218_s29 = sand.u32 (!%p1399_p10), 1, %s952_s16   ;;  %p1400_p1 = scmp.ne.s32.totalorder (!%p1399_p10), %s1379_s27, 0 }
  0x6f   : > { %195 = sbr.rel (%p1399_p10) target bundleno = 460 (0x1cc), region = 28  ;;  %s538_s30 = sshll.u32 (!%p1399_p10), %s1218_s29, 4 }
  0x70   : > { %s198_s24 = scalar_lea.sflag (!%p1399_p10), [#allocation4], %s1218_s29  ;;  %s1222_s2 = scalar_lea.vmem (!%p1399_p10), [#allocation3], %s538_s30 }
  0x76   : > { %919 = dma.done.wait (%p1400_p1), %s198_s24, 256  }
  0x77   : > { %921 = vsyncadd (%p1400_p1), %s198_s24, 4294967040  ;;  %p1401_p7 = scmp.ne.s32.totalorder %s1377_s25, 0 }
  0x79   : > { %923 = dma.done.wait (%p1401_p7), [#allocation7], 2048  }
  0x7a   : > { %925 = vsyncadd (%p1401_p7), [#allocation7], 4294965248  ;;  %s230_s3 = sand.u32 1, %s940_s13   ;;  %s1237_s23 = scalar_lea.vmem [#allocation8], %s538_s30 }
  0x7b   : > { %s1235_s5 = sshll.u32 %s230_s3, 1  ;;  %p542_p9 = scmp.ne.s32.totalorder %s960_s18, 0 }
  0x7c   : > { %s232_s11 = scalar_lea.vmem [#allocation9], %s1235_s5  ;;  %v982_v0 = vmov (!%p542_p9), 0.0  }
  0x7d   : > { %238 = sbr.rel (%p542_p9) target bundleno = 132 (0x84), region = 40  ;;  %239 = vst [vmem:[#allocation2] sm:$0x3] (!%p542_p9), %v982_v0 }
  0x84 PF: > { %v242_v1 = vld [vmem:[#allocation6] sm:$0xff]  ;;  %v243_v2 = vld [vmem:[#allocation6 + $0x8] sm:$0xff]  ;;  %v244_v3 = vld [vmem:[#allocation6 + $0x10] sm:$0xff]  ;;  %vm352_vm0 = vcmask 1040384   ;;  %p543_p11 = scmp.ne.s32.totalorder %s960_s18, 3 }
  0x85   : > { %v605_v4 = vpack.c.bf16 %v243_v2, %v242_v1  ;;  %v245_v5 = vld [vmem:[#allocation6 + $0x18] sm:$0xff]  ;;  %v246_v7 = vld [vmem:[#allocation6 + $0x20] sm:$0xff]  ;;  %v247_v8 = vld [vmem:[#allocation6 + $0x28] sm:$0xff] }
  0x86   : > { %v609_v6 = vpack.c.bf16 %v245_v5, %v244_v3  ;;  %v613_v9 = vpack.c.bf16 %v247_v8, %v246_v7  ;;  %v240_v10 = vld [vmem:[%s1222_s2] sm:$0xff]  ;;  %v249_v12 = vld [vmem:[#allocation6 + $0x38] sm:$0xff]  ;;  %v251_v15 = vld [vmem:[#allocation6 + $0x48] sm:$0xff] }
  0x87   : > { %606 = vmatprep.subr.bf16.mxu0 %v605_v4  ;;  %v248_v11 = vld [vmem:[#allocation6 + $0x30] sm:$0xff]  ;;  %602 = vmatprep.mubr.f32.mxu0 %v240_v10  ;;  %v250_v14 = vld [vmem:[#allocation6 + $0x40] sm:$0xff]  ;;  %v253_v18 = vld [vmem:[#allocation6 + $0x58] sm:$0xff] }
  0x88   : > { %608 = vmatpush3.bf16.msra.mxu0 %v605_v4  ;;  %v617_v13 = vpack.c.bf16 %v249_v12, %v248_v11  ;;  %v621_v16 = vpack.c.bf16 %v251_v15, %v250_v14  ;;  %v252_v17 = vld [vmem:[#allocation6 + $0x50] sm:$0xff]  ;;  %v254_v20 = vld [vmem:[#allocation6 + $0x60] sm:$0xff]  ;;  %v255_v21 = vld [vmem:[#allocation6 + $0x68] sm:$0xff] }
  0x89   : > { %610 = vmatprep.subr.bf16.mxu0 %v609_v6  ;;  %v625_v19 = vpack.c.bf16 %v253_v18, %v252_v17  ;;  %v629_v22 = vpack.c.bf16 %v255_v21, %v254_v20  ;;  %v256_v23 = vld [vmem:[#allocation6 + $0x70] sm:$0xff]  ;;  %v257_v24 = vld [vmem:[#allocation6 + $0x78] sm:$0xff] }
  0x8a   : > { %v633_v25 = vpack.c.bf16 %v257_v24, %v256_v23  ;;  %v241_v26 = vld [vmem:[%s1222_s2 + $0x8] sm:$0xff] }
  0x8b   : > { %v351_v45 = vld [vmem:[#allocation2] sm:$0x3] }
  0x8c   : > { %612 = vmatpush3.bf16.msra.mxu0 %v609_v6 }
  0x8d   : > { %614 = vmatprep.subr.bf16.mxu0 %v613_v9 }
  0x90   : > { %616 = vmatpush3.bf16.msra.mxu0 %v613_v9 }
  0x91   : > { %618 = vmatprep.subr.bf16.mxu0 %v617_v13 }
  0x94   : > { %620 = vmatpush3.bf16.msra.mxu0 %v617_v13 }
  0x95   : > { %622 = vmatprep.subr.bf16.mxu0 %v621_v16 }
  0x98   : > { %624 = vmatpush3.bf16.msra.mxu0 %v621_v16 }
  0x99   : > { %626 = vmatprep.subr.bf16.mxu0 %v625_v19 }
  0x9c   : > { %628 = vmatpush3.bf16.msra.mxu0 %v625_v19 }
  0x9d   : > { %630 = vmatprep.subr.bf16.mxu0 %v629_v22 }
  0xa0   : > { %632 = vmatpush3.bf16.msra.mxu0 %v629_v22 }
  0xa1   : > { %634 = vmatprep.subr.bf16.mxu0 %v633_v25 }
  0xa4   : > { %636 = vmatpush3.bf16.msra.mxu0 %v633_v25 }
  0xa7   : > { %603 = vmatmul.mubr.f32.vlgmr.msra.gmra.mrb[0].mxu0 %v241_v26 }
 0x17a   : > { %v604_v27 = vpop.f32.mrb[0].mxu0 }
 0x17b   : > { %334 = vst [vmem:[%s1237_s23 + $0x8] sm:$0xff] %v604_v27  ;;  %v343_v28 = vmul.f32 %v604_v27, %v604_v27  ;;  %v324_v29 = vpop.f32.mrb[1].mxu0 }
 0x17c   : > { %333 = vst [vmem:[%s1237_s23] sm:$0xff] %v324_v29  ;;  %v335_v30 = vadd.f32 %v604_v27, %v324_v29  ;;  %v342_v31 = vmul.f32 %v324_v29, %v324_v29 }
 0x17e   : > { %v336_v32 = vrot.slane %v335_v30, 4  ;;  %v344_v33 = vadd.f32 %v343_v28, %v342_v31 }
 0x180   : > { %v337_v34 = vadd.f32 %v336_v32, %v335_v30  ;;  %v345_v35 = vrot.slane %v344_v33, 4 }
 0x182   : > { %v338_v36 = vrot.slane %v337_v34, 2  ;;  %v346_v37 = vadd.f32 %v345_v35, %v344_v33 }
 0x184   : > { %v339_v38 = vadd.f32 %v338_v36, %v337_v34  ;;  %v347_v39 = vrot.slane %v346_v37, 2 }
 0x186   : > { %v340_v40 = vrot.slane %v339_v38, 1  ;;  %v348_v41 = vadd.f32 %v347_v39, %v346_v37 }
 0x188   : > { %v349_v42 = vrot.slane %v348_v41, 1  ;;  %v341_v43 = vadd.f32 %v340_v40, %v339_v38 }
 0x189   : > { %359 = sbr.rel (%p543_p11) target bundleno = 408 (0x198), region = 44 }
 0x18a   : > { %v350_v44 = vadd.f32 %v349_v42, %v348_v41 }
 0x18c   : > { %v353_v46 = vsel %vm352_vm0, %v341_v43, %v350_v44 }
 0x18d   : > { %v354_v47 = vadd.f32 %v353_v46, %v351_v45 }
 0x18f   : > { %355 = vst [vmem:[#allocation2] sm:$0x3] %v354_v47 }
 0x196   : > { %v360_v48 = vld [vmem:[#allocation2] sm:$0x3] }
 0x197   : > { %361 = vst [vmem:[%s232_s11] sm:$0x3] %v360_v48 }
 0x198 PF: > { %s546_s25 = sshll.u32 %s960_s18, 1  ;;  %s547_s27 = sshll.u32 %s964_s19, 3 }
 0x199   : > { %s383_s1 = sshll.u32 %s1237_s23, 4  ;;  %s380_s8 = sadd.s32 %s547_s27, %s546_s25  ;;  %s1251_s1 = int_to_ptr.vmem [resolvable:$true] %s383_s1 }
 0x19a   : > { %s548_s6 = sshll.u32 %s380_s8, 7  ;;  %s1402_s9 = sld [smem:[#allocation24_spill]] }
 0x19b   : > { %s363_s15 = scalar_lea.sflag [#allocation5], %s1218_s29  ;;  %s818_s30 = scalar_lea.vmem %s1251_s1, 256 }
 0x19c   : > { %p819_p0 = scmp.ne.s32.totalorder %s1251_s1, %s818_s30  ;;  %s983_s18 = smov [#allocation8]  }
 0x19d   : > { %s822_s24 = sshll.u32 %s983_s18, 4  ;;  %s823_s24 = int_to_ptr.vmem [resolvable:$false] %s822_s24 }
 0x19e   : > { %p820_p3 = pnand %p819_p0, %p1149_p12  ;;  %s824_s2 = scalar_lea.vmem %s823_s24, 512 }
 0x19f   : > { %p825_p8 = scmp.lt.s32.totalorder %s1251_s1, %s823_s24  ;;  %p826_p13 = scmp.lt.s32.totalorder %s824_s2, %s818_s30 }
 0x1a0   : > { %s1256_s28 = scalar_lea.hbm %s1402_s9, %s548_s6  ;;  %p821_p6 = pneg %p820_p3 }
 0x1a1   : > { %p827_p2 = por %p826_p13, %p825_p8 }
 0x1a3   : > { %p828_p4 = pnand %p827_p2, %p821_p6 }
 0x1a5   : > { %831 = shalt.err (!%p828_p4)
}
 0x1a6   : > { %s832_s23 = scalar_lea.hbm %s1256_s28, 256  ;;  %s836_s8 = scalar_lea.hbm %s1402_s9, 2048 }
 0x1a7   : > { %p833_p5 = scmp.ne.s32.totalorder %s1256_s28, %s832_s23  ;;  %p837_p7 = scmp.lt.u32.totalorder %s1256_s28, %s1402_s9 }
 0x1a8   : > { %p838_p9 = scmp.lt.u32.totalorder %s836_s8, %s832_s23  ;;  %p840_p0 = scmp.lt.u32.totalorder %s832_s23, %s1256_s28 }
 0x1a9   : > { %p834_p10 = pnand %p833_p5, %p1149_p12 }
 0x1aa   : > { %p839_p11 = por %p838_p9, %p837_p7 }
 0x1ab   : > { %p835_p1 = pneg %p834_p10 }
 0x1ac   : > { %p841_p3 = por %p840_p0, %p839_p11 }
 0x1ae   : > { %p842_p6 = pnand %p841_p3, %p835_p1 }
 0x1b0   : > { %845 = shalt.err (!%p842_p6)
}
 0x1b1   : > { %s984_s10 = smov 128   ;;  %s1403_s30 = sld [smem:[#allocation18_spill]] }
 0x1b2   : > { %s985_s18 = smov 8   ;;  %s549_s24 = sshll.u32 %s964_s19, 5 }
 0x1b3   : > { %643 = dma.vmem_to_hbm [thread:$0]  (%p1149_p12), %s1251_s1, 256, %s1256_s28, %s363_s15, %s984_s10, %s984_s10, %s985_s18  }
 0x1b4   : > { %s1404_s23 = sld [smem:[#allocation25_spill]]  ;;  %s399_s8 = sshll.u32 %s232_s11, 4  ;;  %s400_s8 = int_to_ptr.vmem [resolvable:$true] %s399_s8 }
 0x1b5   : > { %s368_s6 = scalar_lea.sflag [#allocation10], %s230_s3  ;;  %s846_s4 = scalar_lea.vmem %s400_s8, 32 }
 0x1b6   : > { %p847_p8 = scmp.ne.s32.totalorder %s400_s8, %s846_s4  ;;  %s986_s0 = smov [#allocation9]  }
 0x1b7   : > { %p1405_p13 = scmp.ne.s32.totalorder %s1403_s30, 0  ;;  %s850_s7 = sshll.u32 %s986_s0, 4  ;;  %s851_s7 = int_to_ptr.vmem [resolvable:$false] %s850_s7 }
 0x1b8   : > { %s852_s29 = scalar_lea.vmem %s851_s7, 64  ;;  %p853_p12 = scmp.lt.s32.totalorder %s400_s8, %s851_s7 }
 0x1b9   : > { %p848_p2 = pnand %p847_p8, %p1405_p13  ;;  %p854_p5 = scmp.lt.s32.totalorder %s852_s29, %s846_s4 }
 0x1ba   : > { %s1286_s27 = scalar_lea.hbm %s1404_s23, %s549_s24 }
 0x1bb   : > { %p849_p4 = pneg %p848_p2  ;;  %p855_p10 = por %p854_p5, %p853_p12 }
 0x1bd   : > { %p856_p1 = pnand %p855_p10, %p849_p4 }
 0x1bf   : > { %859 = shalt.err (!%p856_p1)
}
 0x1c0   : > { %s860_s19 = scalar_lea.hbm %s1286_s27, 32  ;;  %s864_s0 = scalar_lea.hbm %s1404_s23, 64 }
 0x1c1   : > { %p861_p7 = scmp.ne.s32.totalorder %s1286_s27, %s860_s19  ;;  %p865_p0 = scmp.lt.u32.totalorder %s1286_s27, %s1404_s23 }
 0x1c2   : > { %p866_p3 = scmp.lt.u32.totalorder %s864_s0, %s860_s19  ;;  %p868_p8 = scmp.lt.u32.totalorder %s860_s19, %s1286_s27 }
 0x1c3   : > { %p862_p9 = pnand %p861_p7, %p1405_p13 }
 0x1c4   : > { %p867_p6 = por %p866_p3, %p865_p0 }
 0x1c5   : > { %p863_p11 = pneg %p862_p9 }
 0x1c6   : > { %p869_p2 = por %p868_p8, %p867_p6 }
 0x1c8   : > { %p870_p4 = pnand %p869_p2, %p863_p11 }
 0x1ca   : > { %873 = shalt.err (!%p870_p4)
}
 0x1cb   : > { %644 = dma.vmem_to_hbm [thread:$0]  (%p1405_p13), %s400_s8, 32, %s1286_s27, %s368_s6  }
 0x1cc PF: > { %s1406_s28 = sld [smem:[#allocation16_spill]]  ;;  %s1407_s15 = sld [smem:[#allocation17_spill]] }
 0x1cd   : > { %p665_p12 = scmp.ge.s32.totalorder %s976_s22, 2 }
 0x1d2   : > { %s411_s10 = sand.u32 1, %s1406_s28   ;;  %p1408_p5 = scmp.ne.s32.totalorder %s1407_s15, 0 }
 0x1d3   : > { %s412_s18 = scalar_lea.sflag [#allocation5], %s411_s10 }
 0x1d4   : > { %p656_p10 = pnand %p665_p12, %p1408_p5 }
 0x1d6   : > { %927 = dma.done.wait (!%p656_p10), %s412_s18, 256  }
 0x1d7   : > { %929 = vsyncadd (!%p656_p10), %s412_s18, 4294967040  ;;  %s1409_s24 = sld [smem:[#allocation15_spill]]  ;;  %s1410_s2 = sld [smem:[#allocation19_spill]] }
 0x1dd   : > { %s420_s25 = sand.u32 1, %s1409_s24   ;;  %p1411_p1 = scmp.ne.s32.totalorder %s1410_s2, 0 }
 0x1de   : > { %s421_s4 = scalar_lea.sflag [#allocation10], %s420_s25 }
 0x1df   : > { %p659_p7 = pnand %p665_p12, %p1411_p1 }
 0x1e1   : > { %931 = dma.done.wait (!%p659_p7), %s421_s4, 32  }
 0x1e2   : > { %933 = vsyncadd (!%p659_p7), %s421_s4, 4294967264  ;;  %s24_s22 = sadd.s32 1, %s976_s22   ;;  %s1412_s30 = smov %s1163_s12 }
 0x1e3   : > { %p21_p13 = scmp.ge.s32.totalorder %s24_s22, 10   ;;  %s1413_s27 = sld [smem:[#allocation20_spill]] }
 0x1e4   : > { %s1414_s8 = sld [smem:[#allocation21_spill]]  ;;  %s1415_s12 = smov %s940_s13 }
 0x1e5   : > { %s1416_s13 = smov %s944_s14  ;;  %s1417_s14 = smov %s1412_s30 }
 0x1e6   : > { %s1418_s15 = smov %s952_s16  ;;  %s1419_s16 = smov %s956_s17 }
 0x1e7   : > { %s1420_s17 = smov %s1166_s26  ;;  %s1421_s18 = smov %s968_s20 }
 0x1e8   : > { %s1422_s19 = smov %s972_s21  ;;  %23 = sbr.rel (!%p21_p13) target bundleno = 17 (0x11), region = 102 }
 0x1e9   : > { %s1423_s20 = smov %s1413_s27 }
 0x1ea   : > { %s1424_s21 = smov %s1414_s8 }
 0x1ef   :  { %426 = vsyncpa [#allocation4], 1 }
 0x1f0   :  { %428 = vsyncpa [#allocation4 + $0x1], 1 }
 0x1f1   :  { %429 = vsyncpa [#allocation7], 1 }
 0x1f2   :  { %430 = vsyncpa [#allocation5], 1 }
 0x1f3   :  { %432 = vsyncpa [#allocation5 + $0x1], 1 }
 0x1f4   :  { %433 = vsyncpa [#allocation10], 1 }
 0x1f5   :  { %435 = vsyncpa [#allocation10 + $0x1], 1 }

</bundles_post_ra>
